<compile_context>
chip_gen: v5e
topology: v5e:2x2
jax: 0.10.0
libtpu: 0.0.40
codegen_flags: <defaults>
</compile_context>

<pallas_src>
import jax
import jax.numpy as jnp
from jax.experimental import pallas as pl
from jax.experimental.pallas import tpu as pltpu


def _round_up(v, m):
    return ((v + m - 1) // m) * m


def _sage_layer_kernel(a_ref, inv_ref, mask_ref, h_self_ref, h_nbr_ref,
                       w_ref, b_ref, out_ref, agg_ref):
    """One GraphSAGE layer tile: out = relu([A@h * 1/deg, h] @ [Wl;Wr] + b) * mask.

    Grid = (row tiles i, reduction tiles k). agg_ref is an f32 VMEM accumulator
    holding the (unnormalized) neighbor sum for the current row tile.
    """
    k = pl.program_id(1)

    @pl.when(k == 0)
    def _():
        agg_ref[...] = jnp.zeros_like(agg_ref)

    # bf16 x bf16 -> f32 accumulate on the MXU (neighbor sum for this k-slab).
    agg_ref[...] += jnp.dot(a_ref[...], h_nbr_ref[...],
                            preferred_element_type=jnp.float32)

    @pl.when(k == pl.num_programs(1) - 1)
    def _():
        # Mean aggregation: scale accumulated neighbor sum by 1/deg (f32).
        agg = (agg_ref[...] * inv_ref[...]).astype(jnp.bfloat16)
        # Fused lin_l / lin_r: single MXU contraction with K = 2*in_dim.
        # (For this config in_pad == h_pad == 128, so (A@h)@Wl ordering is
        #  already the cheaper side of the N^2 matmul.)
        cat = jnp.concatenate([agg, h_self_ref[...]], axis=-1)
        h = jnp.dot(cat, w_ref[...], preferred_element_type=jnp.float32)
        h = jnp.maximum(h + b_ref[...], 0.0)      # bias (lin_l only) + ReLU
        # TODO(synk): dropout(p=0.5) is identity in eval mode; training-mode
        # dropout would use pltpu.prng_random_bits + masking here.
        out_ref[...] = (h * mask_ref[...]).astype(out_ref.dtype)  # zero pad rows


def _pool_classify_kernel(h_ref, wc_ref, bc_ref, out_ref, acc_ref):
    """global_add_pool over node-row tiles, then the classifier matmul."""
    i = pl.program_id(0)

    @pl.when(i == 0)
    def _():
        acc_ref[...] = jnp.zeros_like(acc_ref)

    acc_ref[...] += jnp.sum(h_ref[...].astype(jnp.float32), axis=0,
                            keepdims=True)

    @pl.when(i == pl.num_programs(0) - 1)
    def _():
        pooled = acc_ref[...].astype(jnp.bfloat16)
        out_ref[...] = (jnp.dot(pooled, wc_ref[...],
                                preferred_element_type=jnp.float32)
                        + bc_ref[...])


def graphsage_graph_forward(x, edge_attr, edge_index, params, *, tile=512):
    """Plain-JAX glue: lane-dense padding, 0/1 adjacency, per-layer pallas_calls."""
    del edge_attr  # unused by SAGEConv(x, edge_index), matching the PyTorch forward

    n, c_in = x.shape
    hidden = params["layers"][0][0].shape[1]
    out_ch = params["wc"].shape[1]

    # Lane-dense padding (multiples of 128) + node-row padding to the tile.
    c_pad = _round_up(c_in, 128)
    h_pad = _round_up(hidden, 128)
    o_pad = _round_up(out_ch, 128)
    tm = tk = min(tile, _round_up(n, 128))
    n_pad = _round_up(n, tm)

    # Unnormalized edge-count adjacency (bf16-exact small ints) + f32 1/deg.
    src, dst = edge_index[0], edge_index[1]
    adj = jnp.zeros((n_pad, n_pad), jnp.float32).at[dst, src].add(1.0)
    deg = jnp.sum(adj, axis=1, keepdims=True)
    inv_deg = 1.0 / jnp.maximum(deg, 1.0)                       # (n_pad, 1) f32
    mask = (jnp.arange(n_pad) < n).astype(jnp.float32)[:, None]  # zero pad rows
    a_bf = adj.astype(jnp.bfloat16)

    def pad2(w, r, c):
        return jnp.pad(w, ((0, r - w.shape[0]), (0, c - w.shape[1])))

    h = pad2(x.astype(jnp.float32), n_pad, c_pad).astype(jnp.bfloat16)

    for wl, wr, b in params["layers"]:
        in_pad = _round_up(wl.shape[0], 128)
        # Stacked [Wl; Wr] so the projection is one MXU contraction (K = 2*in).
        w_cat = jnp.concatenate(
            [pad2(wl, in_pad, h_pad), pad2(wr, in_pad, h_pad)],
            axis=0).astype(jnp.bfloat16)
        bias = jnp.pad(b, (0, h_pad - b.shape[0])).reshape(1, h_pad)
        bias = bias.astype(jnp.float32)

        grid = (n_pad // tm, n_pad // tk)
        flops = 2 * n_pad * n_pad * in_pad + 4 * n_pad * in_pad * h_pad
        bytes_accessed = (2 * n_pad * n_pad + 4 * n_pad * in_pad
                          + 4 * in_pad * h_pad + 2 * n_pad * h_pad + 8 * n_pad)

        h = pl.pallas_call(
            _sage_layer_kernel,
            out_shape=jax.ShapeDtypeStruct((n_pad, h_pad), jnp.bfloat16),
            grid_spec=pltpu.PrefetchScalarGridSpec(
                num_scalar_prefetch=0,
                grid=grid,
                in_specs=[
                    pl.BlockSpec((tm, tk), lambda i, k: (i, k)),           # A
                    pl.BlockSpec((tm, 1), lambda i, k: (i, 0)),            # 1/deg
                    pl.BlockSpec((tm, 1), lambda i, k: (i, 0)),            # row mask
                    pl.BlockSpec((tm, in_pad), lambda i, k: (i, 0)),       # h (self)
                    pl.BlockSpec((tk, in_pad), lambda i, k: (k, 0)),       # h (nbrs)
                    pl.BlockSpec((2 * in_pad, h_pad), lambda i, k: (0, 0)),  # [Wl;Wr]
                    pl.BlockSpec((1, h_pad), lambda i, k: (0, 0)),         # bias
                ],
                out_specs=pl.BlockSpec((tm, h_pad), lambda i, k: (i, 0)),
                scratch_shapes=[pltpu.VMEM((tm, in_pad), jnp.float32)],
            ),
            compiler_params=pltpu.CompilerParams(
                dimension_semantics=("parallel", "arbitrary")),
            cost_estimate=pl.CostEstimate(flops=flops, transcendentals=0,
                                          bytes_accessed=bytes_accessed),
        )(a_bf, inv_deg, mask, h, h, w_cat, bias)

    wc_pad = pad2(params["wc"], h_pad, o_pad).astype(jnp.bfloat16)
    bc_pad = jnp.pad(params["bc"], (0, o_pad - out_ch)).reshape(1, o_pad)
    bc_pad = bc_pad.astype(jnp.float32)

    out = pl.pallas_call(
        _pool_classify_kernel,
        out_shape=jax.ShapeDtypeStruct((1, o_pad), jnp.float32),
        grid_spec=pltpu.PrefetchScalarGridSpec(
            num_scalar_prefetch=0,
            grid=(n_pad // tm,),
            in_specs=[
                pl.BlockSpec((tm, h_pad), lambda i: (i, 0)),
                pl.BlockSpec((h_pad, o_pad), lambda i: (0, 0)),
                pl.BlockSpec((1, o_pad), lambda i: (0, 0)),
            ],
            out_specs=pl.BlockSpec((1, o_pad), lambda i: (0, 0)),
            scratch_shapes=[pltpu.VMEM((1, h_pad), jnp.float32)],
        ),
        compiler_params=pltpu.CompilerParams(
            dimension_semantics=("arbitrary",)),
    )(h, wc_pad, bc_pad)

    return out[:, :out_ch]


def _reference_forward(x, edge_index, params):
    """Pure-JAX f32 reference mirroring the PyTorch forward."""
    n = x.shape[0]
    src, dst = edge_index[0], edge_index[1]
    adj = jnp.zeros((n, n), jnp.float32).at[dst, src].add(1.0)
    deg = jnp.sum(adj, axis=1, keepdims=True)
    a = adj / jnp.maximum(deg, 1.0)
    h = x
    for wl, wr, b in params["layers"]:
        h = jnp.maximum((a @ h) @ wl + h @ wr + b, 0.0)
    pooled = jnp.sum(h, axis=0, keepdims=True)
    return pooled @ params["wc"] + params["bc"]


def init_params(key, in_channels, hidden_channels, out_channels, num_layers):
    """Deterministic synthetic parameters (shapes follow the PyTorch __init__)."""
    layers = []
    for i in range(num_layers):
        in_dim = in_channels if i == 0 else hidden_channels
        key, k1, k2, k3 = jax.random.split(key, 4)
        wl = 0.1 * jax.random.normal(k1, (in_dim, hidden_channels), jnp.float32)
        wr = 0.1 * jax.random.normal(k2, (in_dim, hidden_channels), jnp.float32)
        b = 0.1 * jax.random.normal(k3, (hidden_channels,), jnp.float32)
        layers.append((wl, wr, b))
    key, kc, kb = jax.random.split(key, 3)
    wc = 0.1 * jax.random.normal(kc, (hidden_channels, out_channels), jnp.float32)
    bc = 0.1 * jax.random.normal(kb, (out_channels,), jnp.float32)
    return {"layers": layers, "wc": wc, "bc": bc}


if __name__ == "__main__":
    in_channels, hidden_channels, out_channels, num_layers = 8, 32, 4, 2
    num_nodes, num_edges = 16, 40

    key = jax.random.PRNGKey(0)
    kx, ke, ks, kd, kp = jax.random.split(key, 5)

    x = jax.random.normal(kx, (num_nodes, in_channels), jnp.float32)
    edge_attr = jax.random.normal(ke, (num_edges, 4), jnp.float32)  # unused
    edge_index = jnp.stack([
        jax.random.randint(ks, (num_edges,), 0, num_nodes),
        jax.random.randint(kd, (num_edges,), 0, num_nodes),
    ], axis=0).astype(jnp.int32)

    params = init_params(kp, in_channels, hidden_channels, out_channels,
                         num_layers)

    fwd = jax.jit(graphsage_graph_forward)
    out = fwd(x, edge_attr, edge_index, params)
    out = jax.block_until_ready(out)
    assert out.shape == (1, out_channels), out.shape

    ref = _reference_forward(x, edge_index, params)
    assert jnp.allclose(out, ref, rtol=1e-1, atol=1e-1), (out, ref)

    print("KERNEL_OK")
</pallas_src>

<mosaic_0001>
module attributes {stable_mosaic.version = 11 : i64} {
  func.func @_sage_layer_kernel(%arg0: i32, %arg1: i32, %arg2: memref<128x128xbf16, #tpu.memory_space<vmem>>, %arg3: memref<128x1xf32, #tpu.memory_space<vmem>>, %arg4: memref<128x1xf32, #tpu.memory_space<vmem>>, %arg5: memref<128x128xbf16, #tpu.memory_space<vmem>>, %arg6: memref<128x128xbf16, #tpu.memory_space<vmem>>, %arg7: memref<256x128xbf16, #tpu.memory_space<vmem>>, %arg8: memref<1x128xf32, #tpu.memory_space<vmem>>, %arg9: memref<128x128xbf16, #tpu.memory_space<vmem>>, %arg10: memref<128x128xf32, #tpu.memory_space<vmem>>) attributes {dimension_semantics = [#tpu.dimension_semantics<parallel>, #tpu.dimension_semantics<arbitrary>], iteration_bounds = array<i64: 1, 1>, scalar_prefetch = 0 : i64, scratch_operands = 1 : i64, tpu.core_type = #tpu.core_type<tc>, window_params = [{transform_indices = @transform_0, window_bounds = array<i64: 128, 128>}, {transform_indices = @transform_1, window_bounds = array<i64: 128, 1>}, {transform_indices = @transform_2, window_bounds = array<i64: 128, 1>}, {transform_indices = @transform_3, window_bounds = array<i64: 128, 128>}, {transform_indices = @transform_4, window_bounds = array<i64: 128, 128>}, {pipeline_mode = #tpu.pipeline_mode<synchronous>, transform_indices = @transform_5, window_bounds = array<i64: 256, 128>}, {pipeline_mode = #tpu.pipeline_mode<synchronous>, transform_indices = @transform_6, window_bounds = array<i64: 1, 128>}, {transform_indices = @transform_7, window_bounds = array<i64: 128, 128>}]} {
    %c0_i32 = arith.constant 0 : i32
    %0 = arith.cmpi eq, %arg1, %c0_i32 : i32
    %1 = arith.extui %0 : i1 to i32
    %c0_i32_0 = arith.constant 0 : i32
    %2 = arith.cmpi ne, %1, %c0_i32_0 : i32
    scf.if %2 {
      %cst_10 = arith.constant 0.000000e+00 : f32
      %12 = vector.broadcast %cst_10 : f32 to vector<128x128xf32>
      %c0_11 = arith.constant 0 : index
      %c0_12 = arith.constant 0 : index
      %13 = vector.load %arg10[%c0_11, %c0_12] : memref<128x128xf32, #tpu.memory_space<vmem>>, vector<128x128xf32>
      tpu.vector_store %arg10[%c0_11, %c0_12], %12 {strides = array<i32>} : memref<128x128xf32, #tpu.memory_space<vmem>>, vector<128x128xf32>,
    } else {
    }
    %c0 = arith.constant 0 : index
    %c0_1 = arith.constant 0 : index
    %3 = vector.load %arg10[%c0, %c0_1] : memref<128x128xf32, #tpu.memory_space<vmem>>, vector<128x128xf32>
    %c0_2 = arith.constant 0 : index
    %c0_3 = arith.constant 0 : index
    %4 = vector.load %arg2[%c0_2, %c0_3] : memref<128x128xbf16, #tpu.memory_space<vmem>>, vector<128x128xbf16>
    %c0_4 = arith.constant 0 : index
    %c0_5 = arith.constant 0 : index
    %5 = vector.load %arg6[%c0_4, %c0_5] : memref<128x128xbf16, #tpu.memory_space<vmem>>, vector<128x128xbf16>
    %cst = arith.constant dense<0.000000e+00> : vector<128x128xf32>
    %6 = tpu.matmul %4, %5, %cst {dimension_numbers = #tpu.dot_dimension_numbers<[1], [0], [0], [1], [0, 0, 1, 1], [], []>} : vector<128x128xbf16>, vector<128x128xbf16>, vector<128x128xf32> -> vector<128x128xf32>
    %7 = arith.addf %3, %6 : vector<128x128xf32>
    %c0_6 = arith.constant 0 : index
    %c0_7 = arith.constant 0 : index
    %8 = vector.load %arg10[%c0_6, %c0_7] : memref<128x128xf32, #tpu.memory_space<vmem>>, vector<128x128xf32>
    tpu.vector_store %arg10[%c0_6, %c0_7], %7 {strides = array<i32>} : memref<128x128xf32, #tpu.memory_space<vmem>>, vector<128x128xf32>,
    %c0_i32_8 = arith.constant 0 : i32
    %9 = arith.cmpi eq, %arg1, %c0_i32_8 : i32
    %10 = arith.extui %9 : i1 to i32
    %c0_i32_9 = arith.constant 0 : i32
    %11 = arith.cmpi ne, %10, %c0_i32_9 : i32
    scf.if %11 {
      %c0_10 = arith.constant 0 : index
      %c0_11 = arith.constant 0 : index
      %12 = vector.load %arg10[%c0_10, %c0_11] : memref<128x128xf32, #tpu.memory_space<vmem>>, vector<128x128xf32>
      %c0_12 = arith.constant 0 : index
      %c0_13 = arith.constant 0 : index
      %13 = vector.load %arg3[%c0_12, %c0_13] : memref<128x1xf32, #tpu.memory_space<vmem>>, vector<128x1xf32>
      %14 = vector.broadcast %13 : vector<128x1xf32> to vector<128x128xf32>
      %15 = arith.mulf %12, %14 : vector<128x128xf32>
      %16 = arith.truncf %15 : vector<128x128xf32> to vector<128x128xbf16>
      %c0_14 = arith.constant 0 : index
      %c0_15 = arith.constant 0 : index
      %17 = vector.load %arg5[%c0_14, %c0_15] : memref<128x128xbf16, #tpu.memory_space<vmem>>, vector<128x128xbf16>
      %18 = tpu.concatenate %16, %17 in 1 : vector<128x128xbf16>, vector<128x128xbf16> -> vector<128x256xbf16>
      %c0_16 = arith.constant 0 : index
      %c0_17 = arith.constant 0 : index
      %19 = vector.load %arg7[%c0_16, %c0_17] : memref<256x128xbf16, #tpu.memory_space<vmem>>, vector<256x128xbf16>
      %cst_18 = arith.constant dense<0.000000e+00> : vector<128x128xf32>
      %20 = tpu.matmul %18, %19, %cst_18 {dimension_numbers = #tpu.dot_dimension_numbers<[1], [0], [0], [1], [0, 0, 1, 1], [], []>} : vector<128x256xbf16>, vector<256x128xbf16>, vector<128x128xf32> -> vector<128x128xf32>
      %c0_19 = arith.constant 0 : index
      %c0_20 = arith.constant 0 : index
      %21 = vector.load %arg8[%c0_19, %c0_20] : memref<1x128xf32, #tpu.memory_space<vmem>>, vector<1x128xf32>
      %22 = vector.broadcast %21 : vector<1x128xf32> to vector<128x128xf32>
      %23 = arith.addf %20, %22 : vector<128x128xf32>
      %cst_21 = arith.constant 0.000000e+00 : f32
      %24 = vector.broadcast %cst_21 : f32 to vector<128x128xf32>
      %25 = arith.maximumf %23, %24 : vector<128x128xf32>
      %c0_22 = arith.constant 0 : index
      %c0_23 = arith.constant 0 : index
      %26 = vector.load %arg4[%c0_22, %c0_23] : memref<128x1xf32, #tpu.memory_space<vmem>>, vector<128x1xf32>
      %27 = vector.broadcast %26 : vector<128x1xf32> to vector<128x128xf32>
      %28 = arith.mulf %25, %27 : vector<128x128xf32>
      %29 = arith.truncf %28 : vector<128x128xf32> to vector<128x128xbf16>
      %c0_24 = arith.constant 0 : index
      %c0_25 = arith.constant 0 : index
      %30 = vector.load %arg9[%c0_24, %c0_25] : memref<128x128xbf16, #tpu.memory_space<vmem>>, vector<128x128xbf16>
      tpu.vector_store %arg9[%c0_24, %c0_25], %29 {strides = array<i32>} : memref<128x128xbf16, #tpu.memory_space<vmem>>, vector<128x128xbf16>,
    } else {
    }
    return
  }
  func.func @transform_0(%arg0: i32, %arg1: i32) -> (i32, i32) {
    %c0_i32 = arith.constant 0 : i32
    return %arg0, %arg1 : i32, i32
  }
  func.func @transform_1(%arg0: i32, %arg1: i32) -> (i32, i32) {
    %c0_i32 = arith.constant 0 : i32
    %c0_i32_0 = arith.constant 0 : i32
    return %arg0, %c0_i32 : i32, i32
  }
  func.func @transform_2(%arg0: i32, %arg1: i32) -> (i32, i32) {
    %c0_i32 = arith.constant 0 : i32
    %c0_i32_0 = arith.constant 0 : i32
    return %arg0, %c0_i32 : i32, i32
  }
  func.func @transform_3(%arg0: i32, %arg1: i32) -> (i32, i32) {
    %c0_i32 = arith.constant 0 : i32
    %c0_i32_0 = arith.constant 0 : i32
    return %arg0, %c0_i32 : i32, i32
  }
  func.func @transform_4(%arg0: i32, %arg1: i32) -> (i32, i32) {
    %c0_i32 = arith.constant 0 : i32
    %c0_i32_0 = arith.constant 0 : i32
    return %arg1, %c0_i32 : i32, i32
  }
  func.func @transform_5(%arg0: i32, %arg1: i32) -> (i32, i32) {
    %c0_i32 = arith.constant 0 : i32
    %c0_i32_0 = arith.constant 0 : i32
    %c0_i32_1 = arith.constant 0 : i32
    return %c0_i32, %c0_i32_0 : i32, i32
  }
  func.func @transform_6(%arg0: i32, %arg1: i32) -> (i32, i32) {
    %c0_i32 = arith.constant 0 : i32
    %c0_i32_0 = arith.constant 0 : i32
    %c0_i32_1 = arith.constant 0 : i32
    return %c0_i32, %c0_i32_0 : i32, i32
  }
  func.func @transform_7(%arg0: i32, %arg1: i32) -> (i32, i32) {
    %c0_i32 = arith.constant 0 : i32
    %c0_i32_0 = arith.constant 0 : i32
    return %arg0, %c0_i32 : i32, i32
  }
}

module attributes {stable_mosaic.version = 11 : i64} {
  func.func @_pool_classify_kernel(%arg0: i32, %arg1: memref<128x128xbf16, #tpu.memory_space<vmem>>, %arg2: memref<128x128xbf16, #tpu.memory_space<vmem>>, %arg3: memref<1x128xf32, #tpu.memory_space<vmem>>, %arg4: memref<1x128xf32, #tpu.memory_space<vmem>>, %arg5: memref<1x128xf32, #tpu.memory_space<vmem>>) attributes {dimension_semantics = [#tpu.dimension_semantics<arbitrary>], iteration_bounds = array<i64: 1>, scalar_prefetch = 0 : i64, scratch_operands = 1 : i64, tpu.core_type = #tpu.core_type<tc>, window_params = [{transform_indices = @transform_0, window_bounds = array<i64: 128, 128>}, {pipeline_mode = #tpu.pipeline_mode<synchronous>, transform_indices = @transform_1, window_bounds = array<i64: 128, 128>}, {pipeline_mode = #tpu.pipeline_mode<synchronous>, transform_indices = @transform_2, window_bounds = array<i64: 1, 128>}, {pipeline_mode = #tpu.pipeline_mode<synchronous>, transform_indices = @transform_3, window_bounds = array<i64: 1, 128>}]} {
    %c0_i32 = arith.constant 0 : i32
    %0 = arith.cmpi eq, %arg0, %c0_i32 : i32
    %1 = arith.extui %0 : i1 to i32
    %c0_i32_0 = arith.constant 0 : i32
    %2 = arith.cmpi ne, %1, %c0_i32_0 : i32
    scf.if %2 {
      %cst_8 = arith.constant 0.000000e+00 : f32
      %13 = vector.broadcast %cst_8 : f32 to vector<1x128xf32>
      %c0_9 = arith.constant 0 : index
      %c0_10 = arith.constant 0 : index
      %14 = vector.load %arg5[%c0_9, %c0_10] : memref<1x128xf32, #tpu.memory_space<vmem>>, vector<1x128xf32>
      tpu.vector_store %arg5[%c0_9, %c0_10], %13 {strides = array<i32>} : memref<1x128xf32, #tpu.memory_space<vmem>>, vector<1x128xf32>,
    } else {
    }
    %c0 = arith.constant 0 : index
    %c0_1 = arith.constant 0 : index
    %3 = vector.load %arg5[%c0, %c0_1] : memref<1x128xf32, #tpu.memory_space<vmem>>, vector<1x128xf32>
    %c0_2 = arith.constant 0 : index
    %c0_3 = arith.constant 0 : index
    %4 = vector.load %arg1[%c0_2, %c0_3] : memref<128x128xbf16, #tpu.memory_space<vmem>>, vector<128x128xbf16>
    %5 = arith.extf %4 : vector<128x128xbf16> to vector<128x128xf32>
    %cst = arith.constant dense<0.000000e+00> : vector<128xf32>
    %6 = vector.multi_reduction <add>, %5, %cst [0] : vector<128x128xf32> to vector<128xf32>
    %7 = vector.shape_cast %6 : vector<128xf32> to vector<1x128xf32>
    %8 = arith.addf %3, %7 : vector<1x128xf32>
    %c0_4 = arith.constant 0 : index
    %c0_5 = arith.constant 0 : index
    %9 = vector.load %arg5[%c0_4, %c0_5] : memref<1x128xf32, #tpu.memory_space<vmem>>, vector<1x128xf32>
    tpu.vector_store %arg5[%c0_4, %c0_5], %8 {strides = array<i32>} : memref<1x128xf32, #tpu.memory_space<vmem>>, vector<1x128xf32>,
    %c0_i32_6 = arith.constant 0 : i32
    %10 = arith.cmpi eq, %arg0, %c0_i32_6 : i32
    %11 = arith.extui %10 : i1 to i32
    %c0_i32_7 = arith.constant 0 : i32
    %12 = arith.cmpi ne, %11, %c0_i32_7 : i32
    scf.if %12 {
      %c0_8 = arith.constant 0 : index
      %c0_9 = arith.constant 0 : index
      %13 = vector.load %arg5[%c0_8, %c0_9] : memref<1x128xf32, #tpu.memory_space<vmem>>, vector<1x128xf32>
      %14 = arith.truncf %13 : vector<1x128xf32> to vector<1x128xbf16>
      %c0_10 = arith.constant 0 : index
      %c0_11 = arith.constant 0 : index
      %15 = vector.load %arg2[%c0_10, %c0_11] : memref<128x128xbf16, #tpu.memory_space<vmem>>, vector<128x128xbf16>
      %cst_12 = arith.constant dense<0.000000e+00> : vector<1x128xf32>
      %16 = tpu.matmul %14, %15, %cst_12 {dimension_numbers = #tpu.dot_dimension_numbers<[1], [0], [0], [1], [0, 0, 1, 1], [], []>} : vector<1x128xbf16>, vector<128x128xbf16>, vector<1x128xf32> -> vector<1x128xf32>
      %c0_13 = arith.constant 0 : index
      %c0_14 = arith.constant 0 : index
      %17 = vector.load %arg3[%c0_13, %c0_14] : memref<1x128xf32, #tpu.memory_space<vmem>>, vector<1x128xf32>
      %18 = arith.addf %16, %17 : vector<1x128xf32>
      %c0_15 = arith.constant 0 : index
      %c0_16 = arith.constant 0 : index
      %19 = vector.load %arg4[%c0_15, %c0_16] : memref<1x128xf32, #tpu.memory_space<vmem>>, vector<1x128xf32>
      tpu.vector_store %arg4[%c0_15, %c0_16], %18 {strides = array<i32>} : memref<1x128xf32, #tpu.memory_space<vmem>>, vector<1x128xf32>,
    } else {
    }
    return
  }
  func.func @transform_0(%arg0: i32) -> (i32, i32) {
    %c0_i32 = arith.constant 0 : i32
    %c0_i32_0 = arith.constant 0 : i32
    return %arg0, %c0_i32 : i32, i32
  }
  func.func @transform_1(%arg0: i32) -> (i32, i32) {
    %c0_i32 = arith.constant 0 : i32
    %c0_i32_0 = arith.constant 0 : i32
    %c0_i32_1 = arith.constant 0 : i32
    return %c0_i32, %c0_i32_0 : i32, i32
  }
  func.func @transform_2(%arg0: i32) -> (i32, i32) {
    %c0_i32 = arith.constant 0 : i32
    %c0_i32_0 = arith.constant 0 : i32
    %c0_i32_1 = arith.constant 0 : i32
    return %c0_i32, %c0_i32_0 : i32, i32
  }
  func.func @transform_3(%arg0: i32) -> (i32, i32) {
    %c0_i32 = arith.constant 0 : i32
    %c0_i32_0 = arith.constant 0 : i32
    %c0_i32_1 = arith.constant 0 : i32
    return %c0_i32, %c0_i32_0 : i32, i32
  }
}

</mosaic_0001>

<bundles_post_ra>
// kernel: graphsage_graph_forward.5
= control target key start
LH: loop header
LB: loop body
LE: loop exit
PB: predicated region body
PF: predicated region fallthrough
CT: control target
= control target key end

     0   :  { %v283_v1 = vmov 0.0   ;;  %s359_s0 = inlined_call_operand.vmem [shape: bf16[128,128], index: 0, kind: input, shape index: {}]   ;;  %s360_s1 = inlined_call_operand.vmem [shape: bf16[128,128], index: 1, kind: input, shape index: {}]   ;;  %s361_s2 = inlined_call_operand.vmem [shape: f32[1,128], index: 2, kind: input, shape index: {}]   ;;  %s362_s3 = inlined_call_operand.hbm [shape: f32[1,128], index: 3, kind: output, shape index: {}]  }
   0x1   :  { %v215_v0 = vld [vmem:[%s360_s1 + $0x38] sm:$0xff]  ;;  %19 = vst [vmem:[#allocation2] sm:$0x1] %v283_v1  ;;  %v214_v2 = vld [vmem:[%s360_s1 + $0x30] sm:$0xff]  ;;  %v217_v3 = vld [vmem:[%s359_s0] sm:$0xff]  }
   0x2   :  { %146 = vmatpush.bf16.msra.mxu0 %v215_v0  ;;  %v218_v4 = vunpack.c.l.bf16 %v217_v3  ;;  %v219_v5 = vunpack.c.h.bf16 %v217_v3  ;;  %v248_v6 = vld [vmem:[%s359_s0 + $0x8] sm:$0xff]  }
   0x3   :  { %v222_v7 = vunpack.c.l.bf16 %v248_v6 }
   0x4   :  { %8 = vsyncpa [#allocation4], 0  ;;  %v213_v8 = vld [vmem:[%s360_s1 + $0x28] sm:$0xff]  ;;  %v249_v9 = vld [vmem:[%s359_s0 + $0x10] sm:$0xff]   ;;  %v223_v10 = vunpack.c.h.bf16 %v248_v6  ;;  %v53_v11 = vadd.f32 %v219_v5, %v218_v4  ;;  %s284_s17 = smov [#allocation3]   ;;  %s167_s21 = sshll.u32 %s362_s3, 4  ;;  %s168_s21 = int_to_ptr.hbm [resolvable:$true] %s167_s21 }
   0x5   :  { %v226_v12 = vunpack.c.l.bf16 %v249_v9  ;;  %v212_v14 = vld [vmem:[%s360_s1 + $0x20] sm:$0xff]  ;;  %v250_v15 = vld [vmem:[%s359_s0 + $0x18] sm:$0xff]   ;;  %v227_v16 = vunpack.c.h.bf16 %v249_v9  ;;  %v210_v26 = vld [vmem:[%s360_s1 + $0x10] sm:$0xff]  ;;  %s165_s18 = sshll.u32 %s284_s17, 4  ;;  %s166_s18 = int_to_ptr.vmem [resolvable:$true] %s165_s18 }
   0x6   :  { %147 = vmatpush.bf16.msra.mxu0 %v214_v2  ;;  %v54_v13 = vadd.f32 %v222_v7, %v53_v11  ;;  %v230_v18 = vunpack.c.l.bf16 %v250_v15  ;;  %v211_v20 = vld [vmem:[%s360_s1 + $0x18] sm:$0xff]  ;;  %v251_v21 = vld [vmem:[%s359_s0 + $0x20] sm:$0xff]   ;;  %v231_v22 = vunpack.c.h.bf16 %v250_v15  ;;  %v252_v27 = vld [vmem:[%s359_s0 + $0x28] sm:$0xff]  }
   0x7   :  { %v234_v24 = vunpack.c.l.bf16 %v251_v21  ;;  %v235_v28 = vunpack.c.h.bf16 %v251_v21  ;;  %v238_v30 = vunpack.c.l.bf16 %v252_v27  ;;  %v209_v32 = vld [vmem:[%s360_s1 + $0x8] sm:$0xff]  ;;  %v253_v33 = vld [vmem:[%s359_s0 + $0x30] sm:$0xff]   ;;  %v239_v34 = vunpack.c.h.bf16 %v252_v27  ;;  %v208_v38 = vld [vmem:[%s360_s1] sm:$0xff] }
   0x8   :  { %v55_v17 = vadd.f32 %v223_v10, %v54_v13  ;;  %v242_v36 = vunpack.c.l.bf16 %v253_v33  ;;  %v254_v39 = vld [vmem:[%s359_s0 + $0x38] sm:$0xff]   ;;  %v243_v40 = vunpack.c.h.bf16 %v253_v33  ;;  %v20_v53 = vld [vmem:[#allocation2] sm:$0x1] }
   0x9   :  { %v246_v42 = vunpack.c.l.bf16 %v254_v39  ;;  %v247_v44 = vunpack.c.h.bf16 %v254_v39  ;;  %v97_v58 = vld [vmem:[%s361_s2] sm:$0x1] }
   0xa   :  { %148 = vmatpush.bf16.msra.mxu0 %v213_v8  ;;  %v56_v19 = vadd.f32 %v226_v12, %v55_v17 }
   0xc   :  { %v57_v23 = vadd.f32 %v227_v16, %v56_v19 }
   0xe   :  { %149 = vmatpush.bf16.msra.mxu0 %v212_v14  ;;  %v58_v25 = vadd.f32 %v230_v18, %v57_v23 }
  0x10   :  { %v59_v29 = vadd.f32 %v231_v22, %v58_v25 }
  0x12   :  { %150 = vmatpush.bf16.msra.mxu0 %v211_v20  ;;  %v60_v31 = vadd.f32 %v234_v24, %v59_v29 }
  0x14   :  { %v61_v35 = vadd.f32 %v235_v28, %v60_v31 }
  0x16   :  { %151 = vmatpush.bf16.msra.mxu0 %v210_v26  ;;  %v62_v37 = vadd.f32 %v238_v30, %v61_v35 }
  0x18   :  { %v63_v41 = vadd.f32 %v239_v34, %v62_v37 }
  0x1a   :  { %152 = vmatpush.bf16.msra.mxu0 %v209_v32  ;;  %v64_v43 = vadd.f32 %v242_v36, %v63_v41 }
  0x1c   :  { %v65_v45 = vadd.f32 %v243_v40, %v64_v43 }
  0x1e   :  { %153 = vmatpush.bf16.msra.mxu0 %v208_v38  ;;  %v66_v46 = vadd.f32 %v246_v42, %v65_v45 }
  0x20   :  { %v67_v47 = vadd.f32 %v247_v44, %v66_v46 }
  0x22   :  { %v68_v48 = vrot.slane %v67_v47, 4 }
  0x24   :  { %v69_v49 = vadd.f32 %v68_v48, %v67_v47 }
  0x26   :  { %v70_v50 = vrot.slane %v69_v49, 2 }
  0x28   :  { %v71_v51 = vadd.f32 %v70_v50, %v69_v49 }
  0x2a   :  { %v72_v52 = vrot.slane %v71_v51, 1 }
  0x2c   :  { %v73_v54 = vadd.f32 %v72_v52, %v71_v51 }
  0x2e   :  { %v74_v55 = vadd.f32 %v73_v54, %v20_v53 }
  0x30   :  { %75 = vst [vmem:[#allocation2] sm:$0x1] %v74_v55 }
  0x37   :  { %v79_v56 = vld [vmem:[#allocation2] sm:$0x1] }
  0x38   :  { %v80_v57 = vpack.c.bf16 %v79_v56, %v79_v56 }
  0x3a   :  { %154 = vmatmul.bf16.vlgmr.msra.gmra.mxu0 %v80_v57 }
  0xb7   :  { %v155_v59 = vpop.f32.mrf.mxu0 }
  0xb8   :  { %v156_v60 = vadd.f32 %v155_v59, %v97_v58 }
  0xba   :  { %159 = vst [vmem:[#allocation3] sm:$0x1] %v156_v60 }
  0xbb   :  { %170 = dma.vmem_to_hbm [thread:$0]  %s166_s18, 16, %s168_s21, [#allocation4]  }
  0xbf   :  { %v157_v61 = vpop.f32.mrf.mxu0 }
  0xc0   :  { %281 = dma.done.wait [#allocation4], 16  }
  0xc1   :  { %282 = vsyncadd [#allocation4], 4294967280 }
  0xc2   :  { %175 = vsyncpa [#allocation4], 1 }

// kernel: graphsage_graph_forward.3
= control target key start
LH: loop header
LB: loop body
LE: loop exit
PB: predicated region body
PF: predicated region fallthrough
CT: control target
= control target key end

     0   :  { %v1200_v0 = vmov 0   ;;  %s1505_s1 = inlined_call_operand.vmem [shape: f32[128,1], index: 1, kind: input, shape index: {}]   ;;  %s1506_s4 = inlined_call_operand.vmem [shape: bf16[128,128], index: 4, kind: input, shape index: {}, may-alias: {3,4}]   ;;  %s1507_s0 = inlined_call_operand.vmem [shape: bf16[128,128], index: 0, kind: input, shape index: {}]   ;;  %s1508_s2 = inlined_call_operand.vmem [shape: f32[128,1], index: 2, kind: input, shape index: {}]   ;;  %s1509_s5 = inlined_call_operand.vmem [shape: bf16[256,128], index: 5, kind: input, shape index: {}]   ;;  %s1510_s3 = inlined_call_operand.vmem [shape: bf16[128,128], index: 3, kind: input, shape index: {}, may-alias: {3,4}]   ;;  %s1511_s6 = inlined_call_operand.vmem [shape: f32[1,128], index: 6, kind: input, shape index: {}]   ;;  %s1512_s7 = inlined_call_operand.vmem [shape: bf16[128,128], index: 7, kind: output, shape index: {}]  }
   0x1   :  { %1197 = vset.pattern.permute.xlu1 %v1200_v0  ;;  %1196 = vset.pattern.permute.xlu0 %v1200_v0  ;;  %v292_v1 = vld [vmem:[%s1505_s1 + $0x10] sm:$0xff]  ;;  %v290_v2 = vld [vmem:[%s1505_s1] sm:$0xff]  ;;  %v1099_v3 = vld [vmem:[%s1506_s4 + $0x38] sm:$0xff] }
   0x2   :  { %318 = vperm.xlu1 %1197, %v292_v1   ;;  %308 = vperm.xlu0 %1196, %v290_v2   ;;  %v1098_v4 = vld [vmem:[%s1506_s4 + $0x30] sm:$0xff]  ;;  %v302_v5 = vld [vmem:[%s1505_s1 + $0x60] sm:$0xff]  ;;  %v293_v6 = vld [vmem:[%s1505_s1 + $0x18] sm:$0xff] }
   0x3   :  { %190 = vmatpush.bf16.msra.mxu0 %v1099_v3  ;;  %1171 = vmatpush.bf16.msra.mxu3 %v1099_v3  ;;  %v291_v7 = vld [vmem:[%s1505_s1 + $0x8] sm:$0xff]  ;;  %v1096_v9 = vld [vmem:[%s1506_s4 + $0x20] sm:$0xff]  ;;  %v1095_v13 = vld [vmem:[%s1506_s4 + $0x18] sm:$0xff] }
   0x4   :  { %1198 = vset.pattern.permute.xlu2 %v1200_v0  ;;  %v1097_v8 = vld [vmem:[%s1506_s4 + $0x28] sm:$0xff]  ;;  %v294_v12 = vld [vmem:[%s1505_s1 + $0x20] sm:$0xff]  ;;  %v1094_v14 = vld [vmem:[%s1506_s4 + $0x10] sm:$0xff] }
   0x5   :  { %368 = vperm.xlu2 %1198, %v302_v5   ;;  %v303_v10 = vld [vmem:[%s1505_s1 + $0x68] sm:$0xff]  ;;  %v304_v15 = vld [vmem:[%s1505_s1 + $0x70] sm:$0xff]  ;;  %v305_v17 = vld [vmem:[%s1505_s1 + $0x78] sm:$0xff] }
   0x6   :  { %v295_v11 = vld [vmem:[%s1505_s1 + $0x28] sm:$0xff]  ;;  %v296_v16 = vld [vmem:[%s1505_s1 + $0x30] sm:$0xff]  ;;  %v1092_v19 = vld [vmem:[%s1506_s4] sm:$0xff] }
   0x7   :  { %191 = vmatpush.bf16.msra.mxu0 %v1098_v4  ;;  %1172 = vmatpush.bf16.msra.mxu3 %v1098_v4  ;;  %v1093_v18 = vld [vmem:[%s1506_s4 + $0x8] sm:$0xff]  ;;  %v297_v20 = vld [vmem:[%s1505_s1 + $0x38] sm:$0xff]  ;;  %v298_v22 = vld [vmem:[%s1505_s1 + $0x40] sm:$0xff] }
   0x8   :  { %v299_v21 = vld [vmem:[%s1505_s1 + $0x48] sm:$0xff]  ;;  %v1084_v23 = vld [vmem:[%s1507_s0] sm:$0xff]  ;;  %v1090_v24 = vld [vmem:[%s1507_s0 + $0x30] sm:$0xff] }
   0x9   :  { %v300_v25 = vld [vmem:[%s1505_s1 + $0x50] sm:$0xff]  ;;  %v776_v26 = vld [vmem:[%s1508_s2] sm:$0xff]  ;;  %v301_v27 = vld [vmem:[%s1505_s1 + $0x58] sm:$0xff] }
   0xa   :  { %323 = vperm.xlu1 %1197, %v293_v6   ;;  %313 = vperm.xlu0 %1196, %v291_v7   ;;  %v777_v28 = vld [vmem:[%s1508_s2 + $0x8] sm:$0xff]  ;;  %v779_v29 = vld [vmem:[%s1508_s2 + $0x18] sm:$0xff]  ;;  %v778_v30 = vld [vmem:[%s1508_s2 + $0x10] sm:$0xff] }
   0xb   :  { %192 = vmatpush.bf16.msra.mxu0 %v1097_v8  ;;  %1173 = vmatpush.bf16.msra.mxu3 %v1097_v8  ;;  %v1085_v31 = vld [vmem:[%s1507_s0 + $0x8] sm:$0xff]  ;;  %v1091_v32 = vld [vmem:[%s1507_s0 + $0x38] sm:$0xff]  ;;  %v780_v33 = vld [vmem:[%s1508_s2 + $0x20] sm:$0xff] }
   0xc   :  { %v782_v34 = vld [vmem:[%s1508_s2 + $0x30] sm:$0xff]  ;;  %v781_v35 = vld [vmem:[%s1508_s2 + $0x28] sm:$0xff]  ;;  %v783_v36 = vld [vmem:[%s1508_s2 + $0x38] sm:$0xff] }
   0xd   :  { %373 = vperm.xlu2 %1198, %v303_v10   ;;  %v785_v37 = vld [vmem:[%s1508_s2 + $0x48] sm:$0xff]  ;;  %v784_v38 = vld [vmem:[%s1508_s2 + $0x40] sm:$0xff]  ;;  %v1086_v39 = vld [vmem:[%s1507_s0 + $0x10] sm:$0xff] }
   0xe   :  { %v786_v40 = vld [vmem:[%s1508_s2 + $0x50] sm:$0xff]  ;;  %v788_v41 = vld [vmem:[%s1508_s2 + $0x60] sm:$0xff]  ;;  %v787_v42 = vld [vmem:[%s1508_s2 + $0x58] sm:$0xff] }
   0xf   :  { %193 = vmatpush.bf16.msra.mxu0 %v1096_v9  ;;  %1174 = vmatpush.bf16.msra.mxu3 %v1096_v9  ;;  %v789_v43 = vld [vmem:[%s1508_s2 + $0x68] sm:$0xff]  ;;  %v791_v44 = vld [vmem:[%s1508_s2 + $0x78] sm:$0xff]  ;;  %v790_v45 = vld [vmem:[%s1508_s2 + $0x70] sm:$0xff] }
  0x10   :  { %v1087_v46 = vld [vmem:[%s1507_s0 + $0x18] sm:$0xff]  ;;  %v1088_v47 = vld [vmem:[%s1507_s0 + $0x20] sm:$0xff]  ;;  %v1122_v49 = vld [vmem:[%s1509_s5 + $0x70] sm:$0xff] }
  0x11   :  { %v1123_v48 = vld [vmem:[%s1509_s5 + $0x78] sm:$0xff]  ;;  %v1121_v50 = vld [vmem:[%s1509_s5 + $0x68] sm:$0xff]  ;;  %v1120_v52 = vld [vmem:[%s1509_s5 + $0x60] sm:$0xff] }
  0x12   :  { %333 = vperm.xlu1 %1197, %v295_v11   ;;  %328 = vperm.xlu0 %1196, %v294_v12   ;;  %v1115_v51 = vld [vmem:[%s1509_s5 + $0x38] sm:$0xff]  ;;  %v1089_v53 = vld [vmem:[%s1507_s0 + $0x28] sm:$0xff]  ;;  %v1114_v54 = vld [vmem:[%s1509_s5 + $0x30] sm:$0xff] }
  0x13   :  { %194 = vmatpush.bf16.msra.mxu0 %v1095_v13  ;;  %1175 = vmatpush.bf16.msra.mxu3 %v1095_v13  ;;  %v1119_v55 = vld [vmem:[%s1509_s5 + $0x58] sm:$0xff]  ;;  %v1113_v56 = vld [vmem:[%s1509_s5 + $0x28] sm:$0xff]  ;;  %v1118_v57 = vld [vmem:[%s1509_s5 + $0x50] sm:$0xff] }
  0x14   :  { %711 = vmatpush.bf16.msra.mxu2 %v1123_v48  ;;  %662 = vmatpush.bf16.msra.mxu1 %v1115_v51  ;;  %v1112_v58 = vld [vmem:[%s1509_s5 + $0x20] sm:$0xff]  ;;  %v1117_v59 = vld [vmem:[%s1509_s5 + $0x48] sm:$0xff]  ;;  %v1111_v60 = vld [vmem:[%s1509_s5 + $0x18] sm:$0xff] }
  0x15   :  { %378 = vperm.xlu2 %1198, %v304_v15   ;;  %v1116_v61 = vld [vmem:[%s1509_s5 + $0x40] sm:$0xff]  ;;  %v1110_v63 = vld [vmem:[%s1509_s5 + $0x10] sm:$0xff]  ;;  %v1109_v0 = vld [vmem:[%s1509_s5 + $0x8] sm:$0xff] }
  0x16   :  { %v1100_v62 = vld [vmem:[%s1510_s3] sm:$0xff]  ;;  %v1101_v2 = vld [vmem:[%s1510_s3 + $0x8] sm:$0xff]  ;;  %v1102_v6 = vld [vmem:[%s1510_s3 + $0x10] sm:$0xff] }
  0x17   :  { %195 = vmatpush.bf16.msra.mxu0 %v1094_v14  ;;  %1176 = vmatpush.bf16.msra.mxu3 %v1094_v14  ;;  %v1108_v1 = vld [vmem:[%s1509_s5] sm:$0xff] }
  0x18   :  { %712 = vmatpush.bf16.msra.mxu2 %v1122_v49  ;;  %663 = vmatpush.bf16.msra.mxu1 %v1114_v54 }
  0x1a   :  { %338 = vperm.xlu1 %1197, %v296_v16   ;;  %383 = vperm.xlu0 %1196, %v305_v17  }
  0x1b   :  { %196 = vmatpush.bf16.msra.mxu0 %v1093_v18  ;;  %1177 = vmatpush.bf16.msra.mxu3 %v1093_v18 }
  0x1c   :  { %713 = vmatpush.bf16.msra.mxu2 %v1121_v50  ;;  %664 = vmatpush.bf16.msra.mxu1 %v1113_v56 }
  0x1d   :  { %343 = vperm.xlu2 %1198, %v297_v20  }
  0x1f   :  { %197 = vmatpush.bf16.msra.mxu0 %v1092_v19  ;;  %1178 = vmatpush.bf16.msra.mxu3 %v1092_v19 }
  0x20   :  { %714 = vmatpush.bf16.msra.mxu2 %v1120_v52  ;;  %665 = vmatpush.bf16.msra.mxu1 %v1112_v58 }
  0x22   :  { %353 = vperm.xlu1 %1197, %v299_v21   ;;  %348 = vperm.xlu0 %1196, %v298_v22  }
  0x23   :  { %198 = vmatmul.bf16.vlgmr.msra.gmra.mxu0 %v1084_v23  ;;  %228 = vmatmul.bf16.vlgmr.msra.gmra.mxu3 %v1090_v24 }
  0x24   :  { %1179 = vmatpush.bf16.msrb.mxu3 %v1115_v51  ;;  %715 = vmatpush.bf16.msra.mxu2 %v1119_v55 }
  0x25   :  { %358 = vperm.xlu2 %1198, %v300_v25   ;;  %666 = vmatpush.bf16.msra.mxu1 %v1111_v60 }
  0x28   :  { %1180 = vmatpush.bf16.msrb.mxu3 %v1114_v54  ;;  %716 = vmatpush.bf16.msra.mxu2 %v1118_v57 }
  0x29   :  { %667 = vmatpush.bf16.msra.mxu1 %v1110_v63 }
  0x2a   :  { %794 = vperm.xlu1 %1197, %v776_v26   ;;  %363 = vperm.xlu0 %1196, %v301_v27   ;;  %v1103_v27 = vld [vmem:[%s1510_s3 + $0x18] sm:$0xff] }
  0x2c   :  { %1181 = vmatpush.bf16.msrb.mxu3 %v1113_v56  ;;  %717 = vmatpush.bf16.msra.mxu2 %v1117_v59 }
  0x2d   :  { %799 = vperm.xlu2 %1198, %v777_v28   ;;  %668 = vmatpush.bf16.msra.mxu1 %v1109_v0 }
  0x30   :  { %1182 = vmatpush.bf16.msrb.mxu3 %v1112_v58  ;;  %718 = vmatpush.bf16.msra.mxu2 %v1116_v61 }
  0x31   :  { %669 = vmatpush.bf16.msra.mxu1 %v1108_v1 }
  0x32   :  { %809 = vperm.xlu1 %1197, %v779_v29   ;;  %804 = vperm.xlu0 %1196, %v778_v30  }
  0x33   :  { %203 = vmatmul.bf16.gmra.mxu0 %v1085_v31  ;;  %233 = vmatmul.bf16.gmra.mxu3 %v1091_v32 }
  0x34   :  { %1183 = vmatpush.bf16.msrb.mxu3 %v1111_v60  ;;  %719 = vmatmul.bf16.vlgmr.msra.gmra.mxu2 %v1100_v62  ;;  %v1106_v62 = vld [vmem:[%s1510_s3 + $0x30] sm:$0xff] }
  0x35   :  { %814 = vperm.xlu2 %1198, %v780_v33  }
  0x38   :  { %1184 = vmatpush.bf16.msrb.mxu3 %v1110_v63  ;;  %v1105_v63 = vld [vmem:[%s1510_s3 + $0x28] sm:$0xff] }
  0x3a   :  { %824 = vperm.xlu1 %1197, %v782_v34   ;;  %819 = vperm.xlu0 %1196, %v781_v35  }
  0x3c   :  { %1185 = vmatpush.bf16.msrb.mxu3 %v1109_v0 }
  0x3d   :  { %829 = vperm.xlu2 %1198, %v783_v36  }
  0x40   :  { %1186 = vmatpush.bf16.msrb.mxu3 %v1108_v1 }
  0x42   :  { %839 = vperm.xlu1 %1197, %v785_v37   ;;  %834 = vperm.xlu0 %1196, %v784_v38  }
  0x43   :  { %208 = vmatmul.bf16.gmra.mxu0 %v1086_v39 }
  0x44   :  { %1187 = vmatpush.bf16.msra.mxu3 %v1123_v48  ;;  %724 = vmatmul.bf16.gmra.mxu2 %v1101_v2 }
  0x45   :  { %844 = vperm.xlu2 %1198, %v786_v40  }
  0x48   :  { %1188 = vmatpush.bf16.msra.mxu3 %v1122_v49 }
  0x4a   :  { %854 = vperm.xlu1 %1197, %v788_v41   ;;  %849 = vperm.xlu0 %1196, %v787_v42  }
  0x4c   :  { %1189 = vmatpush.bf16.msra.mxu3 %v1121_v50  ;;  %v1104_v50 = vld [vmem:[%s1510_s3 + $0x20] sm:$0xff] }
  0x4d   :  { %859 = vperm.xlu2 %1198, %v789_v43  }
  0x50   :  { %1190 = vmatpush.bf16.msra.mxu3 %v1120_v52 }
  0x52   :  { %869 = vperm.xlu1 %1197, %v791_v44   ;;  %864 = vperm.xlu0 %1196, %v790_v45  }
  0x53   :  { %213 = vmatmul.bf16.gmra.mxu0 %v1087_v46 }
  0x54   :  { %1191 = vmatpush.bf16.msra.mxu3 %v1119_v55  ;;  %729 = vmatmul.bf16.gmra.mxu2 %v1102_v6 }
  0x58   :  { %1192 = vmatpush.bf16.msra.mxu3 %v1118_v57 }
  0x5c   :  { %1193 = vmatpush.bf16.msra.mxu3 %v1117_v59 }
  0x5f   :  { %v369_v5 = vpop.permute.xlu2 %368 }
  0x60   :  { %1194 = vmatpush.bf16.msra.mxu3 %v1116_v61 }
  0x63   :  { %218 = vmatmul.bf16.gmra.mxu0 %v1088_v47 }
  0x64   :  { %734 = vmatmul.bf16.gmra.mxu2 %v1103_v27 }
  0x67   :  { %v374_v15 = vpop.permute.xlu2 %373 }
  0x6f   :  { %v379_v36 = vpop.permute.xlu2 %378 }
  0x73   :  { %223 = vmatmul.bf16.gmra.mxu0 %v1089_v53 }
  0x74   :  { %v309_v3 = vpop.permute.xlu0 %308  ;;  %v319_v19 = vpop.permute.xlu1 %318  ;;  %739 = vmatmul.bf16.gmra.mxu2 %v1104_v50 }
  0x77   :  { %v344_v2 = vpop.permute.xlu2 %343 }
  0x7c   :  { %v314_v9 = vpop.permute.xlu0 %313  ;;  %v324_v32 = vpop.permute.xlu1 %323 }
  0x84   :  { %v329_v28 = vpop.permute.xlu0 %328  ;;  %v334_v53 = vpop.permute.xlu1 %333  ;;  %744 = vmatmul.bf16.gmra.mxu2 %v1105_v63 }
  0x8c   :  { %v384_v41 = vpop.permute.xlu0 %383  ;;  %v339_v0 = vpop.permute.xlu1 %338 }
  0xa0   :  { %v199_v4 = vpop.f32.mrf.mxu0 }
  0xa1   :  { %v386_v7 = vmul.f32 %v309_v3, %v199_v4 }
  0xa3   :  { %v402_v11 = vpack.c.bf16 %v386_v7, %v386_v7 }
  0xa5   :  { %v450_v16 = vunpack.c.l.b16 %v402_v11  ;;  %v1107_v11 = vld [vmem:[%s1510_s3 + $0x38] sm:$0xff] }
  0xa6   :  { %v229_v8 = vpop.f32.mrf.mxu3 }
  0xa7   :  { %v398_v12 = vmul.f32 %v369_v5, %v229_v8 }
  0xa8   :  { %v201_v10 = vpop.f32.mrf.mxu0 }
  0xa9   :  { %v387_v13 = vmul.f32 %v314_v9, %v201_v10  ;;  %v414_v17 = vpack.c.bf16 %v398_v12, %v398_v12  ;;  %v349_v12 = vpop.permute.xlu0 %348 }
  0xab   :  { %v403_v14 = vpack.c.bf16 %v387_v13, %v387_v13  ;;  %v462_v24 = vunpack.c.l.b16 %v414_v17 }
  0xad   :  { %v451_v18 = vunpack.c.l.b16 %v403_v14  ;;  %v354_v14 = vpop.permute.xlu1 %353 }
  0xae   :  { %v231_v20 = vpop.f32.mrf.mxu3 }
  0xaf   :  { %v399_v21 = vmul.f32 %v374_v15, %v231_v20  ;;  %v466_v22 = vpack.c.b16 %v451_v18, %v450_v16 }
  0xb0   :  { %v204_v23 = vpop.f32.mrf.mxu0 }
  0xb1   :  { %v415_v25 = vpack.c.bf16 %v399_v21, %v399_v21  ;;  %670 = vmatmul.bf16.vlgmr.msra.gmra.mxu1 %v466_v22  ;;  %v388_v30 = vmul.f32 %v319_v19, %v204_v23  ;;  %v359_v23 = vpop.permute.xlu2 %358 }
  0xb3   :  { %v463_v26 = vunpack.c.l.b16 %v415_v25  ;;  %v404_v34 = vpack.c.bf16 %v388_v30, %v388_v30  ;;  %v364_v25 = vpop.permute.xlu0 %363 }
  0xb5   :  { %v472_v29 = vpack.c.b16 %v463_v26, %v462_v24  ;;  %v452_v39 = vunpack.c.l.b16 %v404_v34 }
  0xb6   :  { %v234_v31 = vpop.f32.mrf.mxu3 }
  0xb7   :  { %700 = vmatmul.bf16.vlgmr.msrb.gmra.mxu3 %v472_v29  ;;  %v400_v37 = vmul.f32 %v379_v36, %v234_v31 }
  0xb8   :  { %v206_v33 = vpop.f32.mrf.mxu0 }
  0xb9   :  { %v389_v35 = vmul.f32 %v324_v32, %v206_v33  ;;  %v416_v43 = vpack.c.bf16 %v400_v37, %v400_v37  ;;  %v720_v33 = vpop.f32.mrf.mxu2 }
  0xbb   :  { %v405_v38 = vpack.c.bf16 %v389_v35, %v389_v35  ;;  %v464_v48 = vunpack.c.l.b16 %v416_v43  ;;  %v1460_v35 = vld [vmem:[%s1511_s6] ss:$0 sm:$0xff] }
  0xbd   :  { %v453_v40 = vunpack.c.l.b16 %v405_v38 }
  0xbe   :  { %v236_v42 = vpop.f32.mrf.mxu3 }
  0xbf   :  { %v401_v44 = vmul.f32 %v384_v41, %v236_v42  ;;  %v467_v45 = vpack.c.b16 %v453_v40, %v452_v39 }
  0xc0   :  { %v209_v46 = vpop.f32.mrf.mxu0 }
  0xc1   :  { %v417_v47 = vpack.c.bf16 %v401_v44, %v401_v44  ;;  %675 = vmatmul.bf16.gmra.mxu1 %v467_v45  ;;  %v390_v51 = vmul.f32 %v329_v28, %v209_v46  ;;  %v722_v34 = vpop.f32.mrf.mxu2 }
  0xc3   :  { %v465_v49 = vunpack.c.l.b16 %v417_v47  ;;  %v406_v55 = vpack.c.bf16 %v390_v51, %v390_v51  ;;  %v800_v47 = vpop.permute.xlu2 %799 }
  0xc5   :  { %v473_v52 = vpack.c.b16 %v465_v49, %v464_v48  ;;  %v454_v58 = vunpack.c.l.b16 %v406_v55  ;;  %v795_v48 = vpop.permute.xlu1 %794 }
  0xc7   :  { %705 = vmatmul.bf16.gmra.mxu3 %v473_v52 }
  0xc8   :  { %v211_v54 = vpop.f32.mrf.mxu0 }
  0xc9   :  { %v391_v56 = vmul.f32 %v334_v53, %v211_v54  ;;  %v725_v37 = vpop.f32.mrf.mxu2 }
  0xcb   :  { %v407_v57 = vpack.c.bf16 %v391_v56, %v391_v56 }
  0xcd   :  { %v455_v59 = vunpack.c.l.b16 %v407_v57 }
  0xcf   :  { %v468_v60 = vpack.c.b16 %v455_v59, %v454_v58  ;;  %v815_v58 = vpop.permute.xlu2 %814 }
  0xd0   :  { %v214_v61 = vpop.f32.mrf.mxu0 }
  0xd1   :  { %680 = vmatmul.bf16.gmra.mxu1 %v468_v60  ;;  %v392_v1 = vmul.f32 %v339_v0, %v214_v61  ;;  %v727_v42 = vpop.f32.mrf.mxu2  ;;  %v810_v60 = vpop.permute.xlu1 %809 }
  0xd3   :  { %v408_v4 = vpack.c.bf16 %v392_v1, %v392_v1  ;;  %v805_v1 = vpop.permute.xlu0 %804 }
  0xd5   :  { %v456_v7 = vunpack.c.l.b16 %v408_v4 }
  0xd7   :  { %749 = vmatmul.bf16.vlgmr.msra.gmra.mxu3 %v1106_v62 }
  0xd8   :  { %v216_v3 = vpop.f32.mrf.mxu0 }
  0xd9   :  { %v393_v5 = vmul.f32 %v344_v2, %v216_v3  ;;  %v730_v55 = vpop.f32.mrf.mxu2 }
  0xdb   :  { %v409_v6 = vpack.c.bf16 %v393_v5, %v393_v5 }
  0xdd   :  { %v457_v8 = vunpack.c.l.b16 %v409_v6 }
  0xdf   :  { %v469_v9 = vpack.c.b16 %v457_v8, %v456_v7  ;;  %v830_v7 = vpop.permute.xlu2 %829 }
  0xe0   :  { %v219_v10 = vpop.f32.mrf.mxu0 }
  0xe1   :  { %685 = vmatmul.bf16.gmra.mxu1 %v469_v9  ;;  %v394_v13 = vmul.f32 %v349_v12, %v219_v10  ;;  %v732_v2 = vpop.f32.mrf.mxu2  ;;  %v825_v9 = vpop.permute.xlu1 %824 }
  0xe3   :  { %v410_v16 = vpack.c.bf16 %v394_v13, %v394_v13 }
  0xe5   :  { %v458_v19 = vunpack.c.l.b16 %v410_v16 }
  0xe7   :  { %754 = vmatmul.bf16.gmra.mxu3 %v1107_v11 }
  0xe8   :  { %v221_v15 = vpop.f32.mrf.mxu0 }
  0xe9   :  { %v395_v17 = vmul.f32 %v354_v14, %v221_v15  ;;  %v735_v13 = vpop.f32.mrf.mxu2  ;;  %v820_v15 = vpop.permute.xlu0 %819 }
  0xeb   :  { %v411_v18 = vpack.c.bf16 %v395_v17, %v395_v17 }
  0xed   :  { %v459_v20 = vunpack.c.l.b16 %v411_v18 }
  0xef   :  { %v470_v21 = vpack.c.b16 %v459_v20, %v458_v19  ;;  %v1474_v19 = vpop.permute.xlu2 %844 }
  0xf0   :  { %v224_v22 = vpop.f32.mrf.mxu0 }
  0xf1   :  { %690 = vmatmul.bf16.gmra.mxu1 %v470_v21  ;;  %v396_v24 = vmul.f32 %v359_v23, %v224_v22  ;;  %v840_v21 = vpop.permute.xlu1 %839 }
  0xf3   :  { %v412_v27 = vpack.c.bf16 %v396_v24, %v396_v24 }
  0xf5   :  { %v460_v30 = vunpack.c.l.b16 %v412_v27 }
  0xf8   :  { %v226_v26 = vpop.f32.mrf.mxu0 }
  0xf9   :  { %v397_v28 = vmul.f32 %v364_v25, %v226_v26 }
  0xfb   :  { %v413_v29 = vpack.c.bf16 %v397_v28, %v397_v28  ;;  %v737_v28 = vpop.f32.mrf.mxu2 }
  0xfd   :  { %v461_v31 = vunpack.c.l.b16 %v413_v29 }
  0xff   :  { %v471_v32 = vpack.c.b16 %v461_v31, %v460_v30  ;;  %v835_v31 = vpop.permute.xlu0 %834 }
 0x101   :  { %695 = vmatmul.bf16.gmra.mxu1 %v471_v32 }
 0x12e   :  { %v671_v36 = vpop.f32.mrf.mxu1 }
 0x12f   :  { %v672_v38 = vadd.f32 %v1460_v35, %v671_v36  ;;  %v860_v36 = vpop.permute.xlu2 %859 }
 0x131   :  { %v721_v39 = vadd.f32 %v720_v33, %v672_v38 }
 0x133   :  { %v760_v43 = vmax.f32 %v721_v39, 0.0  ;;  %v855_v39 = vpop.permute.xlu1 %854 }
 0x135   :  { %v872_v49 = vmul.f32 %v795_v48, %v760_v43 }
 0x136   :  { %v673_v40 = vpop.f32.mrf.mxu1 }
 0x137   :  { %v674_v41 = vadd.f32 %v1460_v35, %v673_v40 }
 0x139   :  { %v723_v44 = vadd.f32 %v722_v34, %v674_v41 }
 0x13a   :  { %v701_v45 = vpop.f32.mrf.mxu3 }
 0x13b   :  { %v761_v46 = vmax.f32 %v723_v44, 0.0  ;;  %v702_v22 = vadd.f32 %v1460_v35, %v701_v45 }
 0x13d   :  { %v873_v50 = vmul.f32 %v800_v47, %v761_v46  ;;  %v740_v47 = vpop.f32.mrf.mxu2 }
 0x13e   :  { %v676_v51 = vpop.f32.mrf.mxu1 }
 0x13f   :  { %v1127_v52 = vpack.c.bf16 %v873_v50, %v872_v49  ;;  %v677_v53 = vadd.f32 %v1460_v35, %v676_v51  ;;  %v850_v50 = vpop.permute.xlu0 %849 }
 0x141   :  { %1128 = vst [vmem:[%s1512_s7] sm:$0xff] %v1127_v52   ;;  %v726_v56 = vadd.f32 %v725_v37, %v677_v53 }
 0x142   :  { %v703_v54 = vpop.f32.mrf.mxu3 }
 0x143   :  { %v762_v61 = vmax.f32 %v726_v56, 0.0  ;;  %v704_v29 = vadd.f32 %v1460_v35, %v703_v54 }
 0x145   :  { %v874_v3 = vmul.f32 %v805_v1, %v762_v61 }
 0x146   :  { %v678_v57 = vpop.f32.mrf.mxu1 }
 0x147   :  { %v679_v59 = vadd.f32 %v1460_v35, %v678_v57 }
 0x149   :  { %v728_v62 = vadd.f32 %v727_v42, %v679_v59 }
 0x14a   :  { %v706_v63 = vpop.f32.mrf.mxu3 }
 0x14b   :  { %v763_v0 = vmax.f32 %v728_v62, 0.0  ;;  %v707_v51 = vadd.f32 %v1460_v35, %v706_v63  ;;  %v742_v62 = vpop.f32.mrf.mxu2 }
 0x14d   :  { %v875_v4 = vmul.f32 %v810_v60, %v763_v0  ;;  %v870_v0 = vpop.permute.xlu1 %869 }
 0x14e   :  { %v681_v5 = vpop.f32.mrf.mxu1 }
 0x14f   :  { %v1132_v6 = vpack.c.bf16 %v875_v4, %v874_v3  ;;  %v682_v8 = vadd.f32 %v1460_v35, %v681_v5 }
 0x151   :  { %1164 = vst [vmem:[%s1512_s7 + $0x8] sm:$0xff] %v1132_v6   ;;  %v731_v11 = vadd.f32 %v730_v55, %v682_v8 }
 0x152   :  { %v708_v10 = vpop.f32.mrf.mxu3 }
 0x153   :  { %v764_v16 = vmax.f32 %v731_v11, 0.0  ;;  %v709_v57 = vadd.f32 %v1460_v35, %v708_v10 }
 0x155   :  { %v876_v23 = vmul.f32 %v815_v58, %v764_v16 }
 0x156   :  { %v683_v12 = vpop.f32.mrf.mxu1 }
 0x157   :  { %v684_v14 = vadd.f32 %v1460_v35, %v683_v12 }
 0x159   :  { %v733_v17 = vadd.f32 %v732_v2, %v684_v14  ;;  %v865_v2 = vpop.permute.xlu0 %864 }
 0x15a   :  { %v750_v18 = vpop.f32.mrf.mxu3 }
 0x15b   :  { %v765_v20 = vmax.f32 %v733_v17, 0.0  ;;  %v751_v27 = vadd.f32 %v750_v18, %v702_v22 }
 0x15d   :  { %v877_v24 = vmul.f32 %v820_v15, %v765_v20  ;;  %v772_v33 = vmax.f32 %v751_v27, 0.0 }
 0x15e   :  { %v686_v25 = vpop.f32.mrf.mxu1 }
 0x15f   :  { %v1137_v26 = vpack.c.bf16 %v877_v24, %v876_v23  ;;  %v687_v30 = vadd.f32 %v1460_v35, %v686_v25  ;;  %v884_v41 = vmul.f32 %v855_v39, %v772_v33 }
 0x161   :  { %1165 = vst [vmem:[%s1512_s7 + $0x10] sm:$0xff] %v1137_v26   ;;  %v736_v37 = vadd.f32 %v735_v13, %v687_v30  ;;  %v745_v13 = vpop.f32.mrf.mxu2 }
 0x162   :  { %v752_v32 = vpop.f32.mrf.mxu3 }
 0x163   :  { %v753_v34 = vadd.f32 %v752_v32, %v704_v29  ;;  %v766_v44 = vmax.f32 %v736_v37, 0.0 }
 0x165   :  { %v773_v38 = vmax.f32 %v753_v34, 0.0  ;;  %v878_v52 = vmul.f32 %v825_v9, %v766_v44 }
 0x166   :  { %v688_v40 = vpop.f32.mrf.mxu1 }
 0x167   :  { %v885_v42 = vmul.f32 %v860_v36, %v773_v38  ;;  %v689_v43 = vadd.f32 %v1460_v35, %v688_v40 }
 0x169   :  { %v1157_v45 = vpack.c.bf16 %v885_v42, %v884_v41  ;;  %v738_v46 = vadd.f32 %v737_v28, %v689_v43  ;;  %v747_v22 = vpop.f32.mrf.mxu2 }
 0x16a   :  { %v755_v48 = vpop.f32.mrf.mxu3 }
 0x16b   :  { %1169 = vst [vmem:[%s1512_s7 + $0x30] sm:$0xff] %v1157_v45   ;;  %v767_v49 = vmax.f32 %v738_v46, 0.0  ;;  %v756_v56 = vadd.f32 %v755_v48, %v707_v51 }
 0x16d   :  { %v879_v53 = vmul.f32 %v830_v7, %v767_v49  ;;  %v774_v60 = vmax.f32 %v756_v56, 0.0 }
 0x16e   :  { %v691_v54 = vpop.f32.mrf.mxu1 }
 0x16f   :  { %v1142_v55 = vpack.c.bf16 %v879_v53, %v878_v52  ;;  %v692_v58 = vadd.f32 %v1460_v35, %v691_v54  ;;  %v886_v4 = vmul.f32 %v865_v2, %v774_v60 }
 0x171   :  { %1166 = vst [vmem:[%s1512_s7 + $0x18] sm:$0xff] %v1142_v55   ;;  %v741_v1 = vadd.f32 %v740_v47, %v692_v58 }
 0x172   :  { %v757_v59 = vpop.f32.mrf.mxu3 }
 0x173   :  { %v758_v61 = vadd.f32 %v757_v59, %v709_v57  ;;  %v768_v7 = vmax.f32 %v741_v1, 0.0 }
 0x175   :  { %v775_v63 = vmax.f32 %v758_v61, 0.0  ;;  %v880_v11 = vmul.f32 %v835_v31, %v768_v7 }
 0x176   :  { %v693_v3 = vpop.f32.mrf.mxu1 }
 0x177   :  { %v887_v5 = vmul.f32 %v870_v0, %v775_v63  ;;  %v694_v6 = vadd.f32 %v1460_v35, %v693_v3 }
 0x179   :  { %v1162_v8 = vpack.c.bf16 %v887_v5, %v886_v4  ;;  %v743_v9 = vadd.f32 %v742_v62, %v694_v6 }
 0x17b   :  { %1170 = vst [vmem:[%s1512_s7 + $0x38] sm:$0xff] %v1162_v8   ;;  %v769_v10 = vmax.f32 %v743_v9, 0.0 }
 0x17d   :  { %v881_v12 = vmul.f32 %v840_v21, %v769_v10 }
 0x17e   :  { %v696_v14 = vpop.f32.mrf.mxu1 }
 0x17f   :  { %v1147_v15 = vpack.c.bf16 %v881_v12, %v880_v11  ;;  %v697_v16 = vadd.f32 %v1460_v35, %v696_v14 }
 0x181   :  { %1167 = vst [vmem:[%s1512_s7 + $0x20] sm:$0xff] %v1147_v15   ;;  %v746_v17 = vadd.f32 %v745_v13, %v697_v16 }
 0x183   :  { %v770_v23 = vmax.f32 %v746_v17, 0.0 }
 0x185   :  { %v882_v26 = vmul.f32 %v1474_v19, %v770_v23 }
 0x186   :  { %v698_v18 = vpop.f32.mrf.mxu1 }
 0x187   :  { %v699_v20 = vadd.f32 %v1460_v35, %v698_v18 }
 0x189   :  { %v748_v24 = vadd.f32 %v747_v22, %v699_v20 }
 0x18b   :  { %v771_v25 = vmax.f32 %v748_v24, 0.0 }
 0x18d   :  { %v883_v21 = vmul.f32 %v850_v50, %v771_v25 }
 0x18f   :  { %v1152_v27 = vpack.c.bf16 %v883_v21, %v882_v26 }
 0x191   :  { %1168 = vst [vmem:[%s1512_s7 + $0x28] sm:$0xff] %v1152_v27  }

</bundles_post_ra>
